<compile_context>
chip_gen: v7x
topology: tpu7x:2x2x1
jax: 0.10.0
libtpu: 0.0.40
codegen_flags: <defaults>
</compile_context>

<pallas_src>
import jax
import jax.numpy as jnp
from jax.experimental import pallas as pl
from jax.experimental.pallas import tpu as pltpu


LANES = 128


def _round_up(n, m):
    return ((n + m - 1) // m) * m


def _default_block_rows():
    """Generation-aware (rows, 128) tile height."""
    try:
        kind = jax.devices()[0].device_kind.lower().replace(" ", "")
    except Exception:
        kind = ""
    if "v5lite" in kind or "v5e" in kind:
        return 2048   # ~820 GB/s HBM: 2048x128 f32 already ~90% amortized
    if "v6" in kind:
        return 4096   # >=4 MiB per operand per grid step on v6e
    if "tpu7" in kind or "v7" in kind:
        return 8192   # v7x 3.2 TB/s: ~9 MiB/step keeps per-step overhead ~10%
    return 4096


def _make_kernels(block_rows, n_elems, has_mask, needs_bounds):
    """Builds the 'none' and reduction kernels for a static configuration."""

    def _bounds():
        # Global element index of every slot in this block; excludes the ragged
        # tail of a partial last block and any sub-128 wrapper padding.
        row = jax.lax.broadcasted_iota(jnp.int32, (block_rows, LANES), 0)
        col = jax.lax.broadcasted_iota(jnp.int32, (block_rows, LANES), 1)
        gidx = (pl.program_id(0) * block_rows + row) * LANES + col
        return gidx < n_elems

    def _elementwise(x_ref, t_ref, m_ref):
        # Upcast per block inside the kernel (inputs stream in native dtype).
        xf = x_ref[...].astype(jnp.float32)
        tf = t_ref[...].astype(jnp.float32)
        nans = jnp.isnan(tf)
        t0 = jnp.where(nans, jnp.float32(0.0), tf)        # target_proxy[nans] = 0
        valid = jnp.logical_not(nans)                      # mask &= ~nans
        if m_ref is not None:
            valid = jnp.logical_and(valid, m_ref[...] != 0)
        if needs_bounds:
            valid = jnp.logical_and(valid, _bounds())
        d = xf - t0
        full = jnp.where(valid, d * d, jnp.float32(0.0))   # criterion + full_loss[~mask]=0
        return full, valid

    if has_mask:
        def none_kernel(x_ref, t_ref, m_ref, o_ref):
            full, _ = _elementwise(x_ref, t_ref, m_ref)
            o_ref[...] = full.astype(o_ref.dtype)

        def red_kernel(x_ref, t_ref, m_ref, ploss_ref, pmask_ref):
            full, valid = _elementwise(x_ref, t_ref, m_ref)
            # (BR,128) -> (BR//8, 8, 128) is a sublane-major layout no-op; the
            # axis-0 sum is pure VPU adds (free filler in this HBM-bound kernel).
            ploss_ref[...] = jnp.sum(full.reshape(-1, 8, LANES), axis=0)
            pmask_ref[...] = jnp.sum(
                valid.astype(jnp.int32).reshape(-1, 8, LANES), axis=0)
    else:
        def none_kernel(x_ref, t_ref, o_ref):
            full, _ = _elementwise(x_ref, t_ref, None)
            o_ref[...] = full.astype(o_ref.dtype)

        def red_kernel(x_ref, t_ref, ploss_ref, pmask_ref):
            full, valid = _elementwise(x_ref, t_ref, None)
            ploss_ref[...] = jnp.sum(full.reshape(-1, 8, LANES), axis=0)
            pmask_ref[...] = jnp.sum(
                valid.astype(jnp.int32).reshape(-1, 8, LANES), axis=0)

    return none_kernel, red_kernel


def masked_mse_loss(x, target, mask=None, reduction="mean", *, block_rows=None):
    """Pallas equivalent of _MaskedLoss.forward with an MSE criterion."""
    if reduction not in ("none", "sum", "mean"):
        raise ValueError(f"unknown reduction {reduction!r}")

    orig_shape = x.shape
    n = int(x.size)
    out_dtype = jnp.promote_types(x.dtype, target.dtype)

    if n == 0:
        if reduction == "none":
            return jnp.zeros(orig_shape, out_dtype)
        if reduction == "sum":
            return jnp.zeros((), out_dtype)
        return jnp.full((), jnp.nan, out_dtype)

    target_rows = block_rows if block_rows is not None else _default_block_rows()
    target_rows = max(8, _round_up(int(target_rows), 8))

    rows_exact = -(-n // LANES)                      # cdiv(n, 128)
    if rows_exact >= target_rows:
        rows = rows_exact                            # no round-up: zero-copy when 128-aligned
        blk_rows = target_rows
    else:
        rows = _round_up(rows_exact, 8)              # small array: one block, multiple of 8
        blk_rows = rows
    n_padded = rows * LANES
    pad = n_padded - n
    nblocks = -(-rows // blk_rows)
    needs_bounds = (pad != 0) or (rows % blk_rows != 0)

    has_mask = mask is not None

    # Native-dtype operands: no wrapper-side f32 upcast (halves HBM reads for
    # bf16 and removes a full-array convert pass before the kernel).
    x_flat = x.reshape(-1)
    t_flat = target.reshape(-1)
    if has_mask:
        # PyTorch bool semantics: any nonzero value counts as True.
        m_flat = (mask.reshape(-1) != 0).astype(jnp.int8)
    if pad:
        # TODO(synk): sizes that are not a multiple of 128 still pay one
        # whole-array pad copy; the padded tail is excluded in-kernel by the
        # global-index bounds mask. 128-aligned sizes stay zero-copy.
        x_flat = jnp.pad(x_flat, (0, pad))
        t_flat = jnp.pad(t_flat, (0, pad))
        if has_mask:
            m_flat = jnp.pad(m_flat, (0, pad))

    operands = [x_flat.reshape(rows, LANES), t_flat.reshape(rows, LANES)]
    if has_mask:
        operands.append(m_flat.reshape(rows, LANES))

    none_kernel, red_kernel = _make_kernels(blk_rows, n, has_mask, needs_bounds)

    blk = pl.BlockSpec((blk_rows, LANES), lambda i: (i, 0))
    in_specs = [blk] * len(operands)
    in_bytes = sum(int(op.dtype.itemsize) for op in operands) * n_padded
    out_itemsize = int(jnp.dtype(out_dtype).itemsize)
    compiler_params = pltpu.CompilerParams(
        dimension_semantics=("parallel",),       # lets v7x split the grid over 2 TCs
        vmem_limit_bytes=48 * 1024 * 1024,       # big-tile headroom; < v7x physical VMEM
    )

    if reduction == "none":
        cost = pl.CostEstimate(
            flops=5 * n_padded,
            transcendentals=0,
            bytes_accessed=in_bytes + out_itemsize * n_padded,
        )
        full = pl.pallas_call(
            none_kernel,
            out_shape=jax.ShapeDtypeStruct((rows, LANES), out_dtype),
            grid=(nblocks,),
            in_specs=in_specs,
            out_specs=blk,
            compiler_params=compiler_params,
            cost_estimate=cost,
        )(*operands)
        out = full.reshape(-1)
        if pad:
            out = out[:n]
        return out.reshape(orig_shape)

    # 'sum' / 'mean': per-block (8,128) partial sums, reduced in the wrapper.
    part_spec = pl.BlockSpec((8, LANES), lambda i: (i, 0))
    cost = pl.CostEstimate(
        flops=7 * n_padded,
        transcendentals=0,
        bytes_accessed=in_bytes + nblocks * 8 * LANES * (4 + 4),
    )
    ploss, pmask = pl.pallas_call(
        red_kernel,
        out_shape=(
            jax.ShapeDtypeStruct((nblocks * 8, LANES), jnp.float32),
            jax.ShapeDtypeStruct((nblocks * 8, LANES), jnp.int32),
        ),
        grid=(nblocks,),
        in_specs=in_specs,
        out_specs=(part_spec, part_spec),
        compiler_params=compiler_params,
        cost_estimate=cost,
    )(*operands)
    loss_sum = jnp.sum(ploss)
    if reduction == "sum":
        return loss_sum.astype(out_dtype)
    # mean: exact int32 valid-element count; 0/0 -> nan (PyTorch-like).
    count = jnp.sum(pmask)
    return (loss_sum / count.astype(jnp.float32)).astype(out_dtype)


# ---- reference & test ------------------------------------------------------

def _reference(x, target, mask, reduction="mean"):
    x = x.astype(jnp.float32)
    target = target.astype(jnp.float32)
    nans = jnp.isnan(target)
    tp = jnp.where(nans, 0.0, target)
    if mask is None:
        mask = jnp.ones(x.shape, dtype=bool)
    m = jnp.logical_and(mask != 0, jnp.logical_not(nans))
    full = (x - tp) ** 2
    full = jnp.where(m, full, 0.0)
    if reduction == "none":
        return full
    if reduction == "sum":
        return full.sum()
    return full.sum() / m.astype(full.dtype).sum()


if __name__ == "__main__":
    key = jax.random.PRNGKey(0)
    k1, k2, k3, k4, k5, k6, k7, k8 = jax.random.split(key, 8)

    # --- case 1: nicely sized NCHW tensor with explicit mask + NaNs ---------
    B, C, H, W = 2, 4, 16, 16            # total = 2048 = 16 * 128 (zero-copy path)
    x = jax.random.normal(k1, (B, C, H, W), dtype=jnp.float32)
    target = jax.random.normal(k2, (B, C, H, W), dtype=jnp.float32)
    nan_sites = jax.random.bernoulli(k3, 0.1, (B, C, H, W))
    target = jnp.where(nan_sites, jnp.nan, target)
    mask = jax.random.bernoulli(k4, 0.8, (B, C, H, W))

    out_mean = masked_mse_loss(x, target, mask, reduction="mean")
    out_sum = masked_mse_loss(x, target, mask, reduction="sum")
    out_none = masked_mse_loss(x, target, mask, reduction="none")
    out_mean_nomask = masked_mse_loss(x, target, None, reduction="mean")
    jax.block_until_ready((out_mean, out_sum, out_none, out_mean_nomask))

    assert jnp.allclose(out_mean, _reference(x, target, mask, "mean"), rtol=1e-5, atol=1e-5)
    assert jnp.allclose(out_sum, _reference(x, target, mask, "sum"), rtol=1e-5, atol=1e-5)
    assert jnp.allclose(out_none, _reference(x, target, mask, "none"), rtol=1e-5, atol=1e-5)
    assert jnp.allclose(out_mean_nomask, _reference(x, target, None, "mean"), rtol=1e-5, atol=1e-5)

    # --- case 1b: tiny block override exercises the multi-block grid path ----
    mb_mean = masked_mse_loss(x, target, mask, reduction="mean", block_rows=8)
    mb_none = masked_mse_loss(x, target, mask, reduction="none", block_rows=8)
    jax.block_until_ready((mb_mean, mb_none))
    assert jnp.allclose(mb_mean, _reference(x, target, mask, "mean"), rtol=1e-5, atol=1e-5)
    assert jnp.allclose(mb_none, _reference(x, target, mask, "none"), rtol=1e-5, atol=1e-5)

    # --- case 2: awkward shape exercising padding + in-kernel bounds mask ----
    shp = (3, 5, 7, 11)                  # 1155 elements -> ragged tail
    x2 = jax.random.normal(k5, shp, dtype=jnp.float32)
    t2 = jax.random.normal(k6, shp, dtype=jnp.float32)
    t2 = jnp.where(jax.random.bernoulli(k7, 0.1, shp), jnp.nan, t2)
    m2 = jax.random.bernoulli(k3, 0.7, shp)

    p_mean = masked_mse_loss(x2, t2, m2, reduction="mean")
    p_none = masked_mse_loss(x2, t2, m2, reduction="none")
    p_mean_nomask = masked_mse_loss(x2, t2, None, reduction="mean")
    # small block override -> partial last block + element-level bounds mask
    p_mean_small = masked_mse_loss(x2, t2, m2, reduction="mean", block_rows=8)
    jax.block_until_ready((p_mean, p_none, p_mean_nomask, p_mean_small))

    assert jnp.allclose(p_mean, _reference(x2, t2, m2, "mean"), rtol=1e-5, atol=1e-5)
    assert jnp.allclose(p_none, _reference(x2, t2, m2, "none"), rtol=1e-5, atol=1e-5)
    assert jnp.allclose(p_mean_nomask, _reference(x2, t2, None, "mean"), rtol=1e-5, atol=1e-5)
    assert jnp.allclose(p_mean_small, _reference(x2, t2, m2, "mean"), rtol=1e-5, atol=1e-5)

    # --- case 3: bf16 inputs stream natively (loose tolerance: bf16 rounding) -
    xb = jax.random.normal(k8, (2, 4, 16, 16), dtype=jnp.bfloat16)
    tb = jax.random.normal(k2, (2, 4, 16, 16), dtype=jnp.bfloat16)
    tb = jnp.where(nan_sites, jnp.nan, tb)
    b_mean = masked_mse_loss(xb, tb, mask, reduction="mean")
    b_none = masked_mse_loss(xb, tb, mask, reduction="none")
    jax.block_until_ready((b_mean, b_none))
    assert jnp.allclose(jnp.float32(b_mean), _reference(xb, tb, mask, "mean"),
                        rtol=2e-2, atol=2e-2)
    assert jnp.allclose(b_none.astype(jnp.float32), _reference(xb, tb, mask, "none"),
                        rtol=2e-2, atol=2e-2)

    print("KERNEL_OK")
</pallas_src>

<mosaic_0001>
module attributes {stable_mosaic.version = 11 : i64} {
  func.func @red_kernel(%arg0: i32, %arg1: memref<16x128xf32, #tpu.memory_space<vmem>>, %arg2: memref<16x128xf32, #tpu.memory_space<vmem>>, %arg3: memref<16x128xi8, #tpu.memory_space<vmem>>, %arg4: memref<8x128xf32, #tpu.memory_space<vmem>>, %arg5: memref<8x128xi32, #tpu.memory_space<vmem>>) attributes {dimension_semantics = [#tpu.dimension_semantics<parallel>], iteration_bounds = array<i64: 1>, scalar_prefetch = 0 : i64, scratch_operands = 0 : i64, tpu.core_type = #tpu.core_type<tc>, window_params = [{transform_indices = @transform_0, window_bounds = array<i64: 16, 128>}, {transform_indices = @transform_1, window_bounds = array<i64: 16, 128>}, {transform_indices = @transform_2, window_bounds = array<i64: 16, 128>}, {transform_indices = @transform_3, window_bounds = array<i64: 8, 128>}, {transform_indices = @transform_4, window_bounds = array<i64: 8, 128>}]} {
    %c0 = arith.constant 0 : index
    %c0_0 = arith.constant 0 : index
    %0 = vector.load %arg1[%c0, %c0_0] : memref<16x128xf32, #tpu.memory_space<vmem>>, vector<16x128xf32>
    %c0_1 = arith.constant 0 : index
    %c0_2 = arith.constant 0 : index
    %1 = vector.load %arg2[%c0_1, %c0_2] : memref<16x128xf32, #tpu.memory_space<vmem>>, vector<16x128xf32>
    %2 = arith.cmpf one, %1, %1 : vector<16x128xf32>
    %cst = arith.constant 0.000000e+00 : f32
    %3 = vector.broadcast %cst : f32 to vector<16x128xf32>
    %4 = arith.select %2, %3, %1 : vector<16x128xi1>, vector<16x128xf32>
    %cst_3 = arith.constant dense<true> : vector<16x128xi1>
    %5 = arith.xori %2, %cst_3 : vector<16x128xi1>
    %c0_4 = arith.constant 0 : index
    %c0_5 = arith.constant 0 : index
    %6 = vector.load %arg3[%c0_4, %c0_5] : memref<16x128xi8, #tpu.memory_space<vmem>>, vector<16x128xi8>
    %c0_i8 = arith.constant 0 : i8
    %7 = vector.broadcast %c0_i8 : i8 to vector<16x128xi8>
    %8 = arith.cmpi ne, %6, %7 : vector<16x128xi8>
    %9 = arith.andi %5, %8 : vector<16x128xi1>
    %10 = arith.subf %0, %4 : vector<16x128xf32>
    %11 = arith.mulf %10, %10 : vector<16x128xf32>
    %cst_6 = arith.constant 0.000000e+00 : f32
    %12 = vector.broadcast %cst_6 : f32 to vector<16x128xf32>
    %13 = arith.select %9, %11, %12 : vector<16x128xi1>, vector<16x128xf32>
    %14 = vector.shape_cast %13 : vector<16x128xf32> to vector<2x8x128xf32>
    %cst_7 = arith.constant dense<0.000000e+00> : vector<8x128xf32>
    %15 = vector.multi_reduction <add>, %14, %cst_7 [0] : vector<2x8x128xf32> to vector<8x128xf32>
    %c0_8 = arith.constant 0 : index
    %c0_9 = arith.constant 0 : index
    %16 = vector.load %arg4[%c0_8, %c0_9] : memref<8x128xf32, #tpu.memory_space<vmem>>, vector<8x128xf32>
    tpu.vector_store %arg4[%c0_8, %c0_9], %15 {strides = array<i32>} : memref<8x128xf32, #tpu.memory_space<vmem>>, vector<8x128xf32>,
    %17 = arith.extui %9 : vector<16x128xi1> to vector<16x128xi32>
    %18 = vector.shape_cast %17 : vector<16x128xi32> to vector<2x8x128xi32>
    %cst_10 = arith.constant dense<0> : vector<8x128xi32>
    %19 = vector.multi_reduction <add>, %18, %cst_10 [0] : vector<2x8x128xi32> to vector<8x128xi32>
    %c0_11 = arith.constant 0 : index
    %c0_12 = arith.constant 0 : index
    %20 = vector.load %arg5[%c0_11, %c0_12] : memref<8x128xi32, #tpu.memory_space<vmem>>, vector<8x128xi32>
    tpu.vector_store %arg5[%c0_11, %c0_12], %19 {strides = array<i32>} : memref<8x128xi32, #tpu.memory_space<vmem>>, vector<8x128xi32>,
    return
  }
  func.func @transform_0(%arg0: i32) -> (i32, i32) {
    %c0_i32 = arith.constant 0 : i32
    %c0_i32_0 = arith.constant 0 : i32
    return %arg0, %c0_i32 : i32, i32
  }
  func.func @transform_1(%arg0: i32) -> (i32, i32) {
    %c0_i32 = arith.constant 0 : i32
    %c0_i32_0 = arith.constant 0 : i32
    return %arg0, %c0_i32 : i32, i32
  }
  func.func @transform_2(%arg0: i32) -> (i32, i32) {
    %c0_i32 = arith.constant 0 : i32
    %c0_i32_0 = arith.constant 0 : i32
    return %arg0, %c0_i32 : i32, i32
  }
  func.func @transform_3(%arg0: i32) -> (i32, i32) {
    %c0_i32 = arith.constant 0 : i32
    %c0_i32_0 = arith.constant 0 : i32
    return %arg0, %c0_i32 : i32, i32
  }
  func.func @transform_4(%arg0: i32) -> (i32, i32) {
    %c0_i32 = arith.constant 0 : i32
    %c0_i32_0 = arith.constant 0 : i32
    return %arg0, %c0_i32 : i32, i32
  }
}

</mosaic_0001>

<bundles_post_ra>
// kernel: tpu_custom_call.1
= control target key start
LH: loop header
LB: loop body
LE: loop exit
PB: predicated region body
PF: predicated region fallthrough
CT: control target
= control target key end

     0   :  { %10 = vsyncpa [#allocation3], 0  ;;  %s303_s0 = inlined_call_operand.hbm [shape: f32[16,128], index: 0, kind: input, shape index: {}]   ;;  %s304_s1 = inlined_call_operand.hbm [shape: f32[16,128], index: 1, kind: input, shape index: {}]   ;;  %s305_s2 = inlined_call_operand.vmem [shape: s8[16,128], index: 2, kind: input, shape index: {}]   ;;  %s306_s3 = inlined_call_operand.hbm [shape: f32[8,128], index: 3, kind: output, shape index: {0}]   ;;  %s307_s4 = inlined_call_operand.hbm [shape: s32[8,128], index: 4, kind: output, shape index: {1}]  }
   0x1   :  { %11 = vsyncpa [#allocation6], 0 }
   0x2   :  { %12 = vsyncpa [#allocation4], 0 }
   0x3   :  { %13 = vsyncpa [#allocation9], 0  ;;  %s216_s15 = smov [#allocation2]   ;;  %s120_s19 = scalar_lea.hbm %s303_s0, 256 }
   0x4   :  { %s19_s16 = sshll.u32 %s216_s15, 4  ;;  %p121_p0 = scmp.ne.s32.totalorder %s303_s0, %s120_s19  ;;  %s20_s16 = int_to_ptr.vmem [resolvable:$true] %s19_s16 }
   0x5   :  { %p124_p1 = scmp.lt.u32.totalorder %s120_s19, %s303_s0 }
   0x7   :  { %p126_p2 = pnand %p124_p1, %p121_p0 }
   0x9   :  { %129 = shalt.err (!%p126_p2)
}
   0xa   :  { %s130_s24 = scalar_lea.vmem %s20_s16, 256  ;;  %p135_p4 = scmp.lt.s32.totalorder %s20_s16, %s20_s16 }
   0xb   :  { %p131_p3 = scmp.ne.s32.totalorder %s20_s16, %s130_s24  ;;  %p136_p5 = scmp.lt.s32.totalorder %s130_s24, %s130_s24 }
   0xd   :  { %p137_p6 = por %p136_p5, %p135_p4 }
   0xf   :  { %p138_p7 = pnand %p137_p6, %p131_p3 }
  0x11   :  { %141 = shalt.err (!%p138_p7)
}
  0x12   :  { %s217_s25 = smov 128   ;;  %s218_s26 = smov 8  }
  0x13   :  { %25 = dma.hbm_to_vmem [thread:$0]  %s303_s0, 256, %s20_s16, [#allocation3], %s217_s25, %s217_s25, %s218_s26  }
  0x14   :  { %s219_s29 = smov [#allocation5]   ;;  %s142_s7 = scalar_lea.hbm %s304_s1, 256 }
  0x15   :  { %s31_s30 = sshll.u32 %s219_s29, 4  ;;  %p143_p8 = scmp.ne.s32.totalorder %s304_s1, %s142_s7  ;;  %s32_s30 = int_to_ptr.vmem [resolvable:$true] %s31_s30 }
  0x16   :  { %p146_p9 = scmp.lt.u32.totalorder %s142_s7, %s304_s1 }
  0x18   :  { %p148_p10 = pnand %p146_p9, %p143_p8 }
  0x1a   :  { %151 = shalt.err (!%p148_p10)
}
  0x1b   :  { %s152_s12 = scalar_lea.vmem %s32_s30, 256  ;;  %p157_p12 = scmp.lt.s32.totalorder %s32_s30, %s32_s30 }
  0x1c   :  { %p153_p11 = scmp.ne.s32.totalorder %s32_s30, %s152_s12  ;;  %p158_p13 = scmp.lt.s32.totalorder %s152_s12, %s152_s12 }
  0x1e   :  { %p159_p0 = por %p158_p13, %p157_p12 }
  0x20   :  { %p160_p1 = pnand %p159_p0, %p153_p11 }
  0x22   :  { %163 = shalt.err (!%p160_p1)
}
  0x23   :  { %37 = dma.hbm_to_vmem [thread:$0]  %s304_s1, 256, %s32_s30, [#allocation6], %s217_s25, %s217_s25, %s218_s26  }
  0x24   :  { %208 = dma.done.wait [#allocation3], 256  }
  0x25   :  { %209 = vsyncadd [#allocation3], 4294967040 }
  0x26   :  { %210 = dma.done.wait [#allocation6], 256  }
  0x27   :  { %211 = vsyncadd [#allocation6], 4294967040  ;;  %v48_v0 = vld [vmem:[#allocation2] sm:$0xff]  ;;  %v49_v1 = vld [vmem:[#allocation2 + $0x8] sm:$0xff]  ;;  %v220_v8 = vmov 0   ;;  %vm221_vm4 = vmmov 1  }
  0x28   :  { %v50_v2 = vld [vmem:[#allocation5] sm:$0xff]  ;;  %v51_v3 = vld [vmem:[#allocation5 + $0x8] sm:$0xff]  ;;  %v58_v4 = vld [vmem:[%s305_s2] sm:$0x3]  ;;  %s222_s1 = smov [#allocation7]   ;;  %s223_s18 = smov [#allocation8]  }
  0x29   :  { %vm52_vm0 = vcmp.ne.f32.partialorder %v50_v2, %v50_v2  ;;  %v59_v5 = vld [vmem:[%s305_s2 + $0x2] sm:$0x3]  ;;  %vm53_vm1 = vcmp.ne.f32.partialorder %v51_v3, %v51_v3  ;;  %vm60_vm2 = vnez %v58_v4  ;;  %s88_s2 = sshll.u32 %s222_s1, 4  ;;  %s98_s19 = sshll.u32 %s223_s18, 4  ;;  %s89_s2 = int_to_ptr.vmem [resolvable:$true] %s88_s2  ;;  %s99_s19 = int_to_ptr.vmem [resolvable:$true] %s98_s19 }
  0x2a   :  { %v54_v6 = vsel %vm52_vm0, 0.0, %v50_v2  ;;  %vm61_vm3 = vnez %v59_v5  ;;  %v55_v7 = vsel %vm53_vm1, 0.0, %v51_v3  ;;  %v62_v9 = vsel %vm60_vm2, 16843009, %v220_v8  ;;  %vm56_vm5 = vmxor %vm52_vm0, %vm221_vm4  ;;  %s164_s20 = scalar_lea.vmem %s89_s2, 128  ;;  %p169_p3 = scmp.lt.s32.totalorder %s89_s2, %s89_s2 }
  0x2b   :  { %v63_v10 = vsel %vm61_vm3, 16843009, %v220_v8  ;;  %v70_v11 = vsub.f32 %v48_v0, %v54_v6  ;;  %v64_v12 = vunpack.c.0.s8 %v62_v9  ;;  %v71_v14 = vsub.f32 %v49_v1, %v55_v7  ;;  %vm57_vm6 = vmxor %vm53_vm1, %vm221_vm4  ;;  %p165_p2 = scmp.ne.s32.totalorder %s89_s2, %s164_s20  ;;  %p170_p4 = scmp.lt.s32.totalorder %s164_s20, %s164_s20 }
  0x2c   :  { %v65_v13 = vunpack.c.0.s8 %v63_v10 }
  0x2d   :  { %v72_v15 = vmul.f32 %v70_v11, %v70_v11  ;;  %vm66_vm7 = vcmp.ne.s32.totalorder %v64_v12, 0  ;;  %v73_v16 = vmul.f32 %v71_v14, %v71_v14  ;;  %p171_p5 = por %p170_p4, %p169_p3 }
  0x2e   :  { %vm67_vm8 = vcmp.ne.s32.totalorder %v65_v13, 0  ;;  %vm68_vm9 = vmand %vm56_vm5, %vm66_vm7 }
  0x2f   :  { %vm69_vm10 = vmand %vm57_vm6, %vm67_vm8  ;;  %v74_v17 = vsel %vm68_vm9, %v72_v15, 0.0  ;;  %v78_v18 = vsel %vm68_vm9, 1, %v220_v8  ;;  %p172_p6 = pnand %p171_p5, %p165_p2 }
  0x30   :  { %v75_v19 = vsel %vm69_vm10, %v73_v16, 0.0  ;;  %v79_v20 = vsel %vm69_vm10, 1, %v220_v8 }
  0x31   :  { %v76_v21 = vadd.f32 %v75_v19, %v74_v17  ;;  %v80_v22 = vadd.s32 %v79_v20, %v78_v18 }
  0x33   :  { %77 = vst [vmem:[#allocation7] sm:$0xff] %v76_v21  ;;  %81 = vst [vmem:[#allocation8] sm:$0xff] %v80_v22 }
  0x34   :  { %175 = shalt.err (!%p172_p6)
}
  0x35   :  { %s176_s23 = scalar_lea.hbm %s306_s3, 128 }
  0x36   :  { %p177_p7 = scmp.ne.s32.totalorder %s306_s3, %s176_s23  ;;  %p180_p8 = scmp.lt.u32.totalorder %s176_s23, %s306_s3 }
  0x38   :  { %p182_p9 = pnand %p180_p8, %p177_p7 }
  0x3a   :  { %185 = shalt.err (!%p182_p9)
}
  0x3b   :  { %91 = dma.vmem_to_hbm [thread:$0]  %s89_s2, 128, %s306_s3, [#allocation4]  }
  0x3c   :  { %s186_s30 = scalar_lea.vmem %s99_s19, 128  ;;  %p191_p11 = scmp.lt.s32.totalorder %s99_s19, %s99_s19 }
  0x3d   :  { %p187_p10 = scmp.ne.s32.totalorder %s99_s19, %s186_s30  ;;  %p192_p12 = scmp.lt.s32.totalorder %s186_s30, %s186_s30 }
  0x3f   :  { %p193_p13 = por %p192_p12, %p191_p11 }
  0x41   :  { %p194_p0 = pnand %p193_p13, %p187_p10 }
  0x43   :  { %197 = shalt.err (!%p194_p0)
}
  0x44   :  { %s198_s7 = scalar_lea.hbm %s307_s4, 128 }
  0x45   :  { %p199_p1 = scmp.ne.s32.totalorder %s307_s4, %s198_s7  ;;  %p202_p2 = scmp.lt.u32.totalorder %s198_s7, %s307_s4 }
  0x47   :  { %p204_p3 = pnand %p202_p2, %p199_p1 }
  0x49   :  { %207 = shalt.err (!%p204_p3)
}
  0x4a   :  { %101 = dma.vmem_to_hbm [thread:$0]  %s99_s19, 128, %s307_s4, [#allocation9]  }
  0x4b   :  { %212 = dma.done.wait [#allocation4], 128  }
  0x4c   :  { %213 = vsyncadd [#allocation4], 4294967168 }
  0x4d   :  { %214 = dma.done.wait [#allocation9], 128  }
  0x4e   :  { %215 = vsyncadd [#allocation9], 4294967168 }
  0x4f   :  { %108 = vsyncpa [#allocation3], 1 }
  0x50   :  { %109 = vsyncpa [#allocation6], 1 }
  0x51   :  { %110 = vsyncpa [#allocation4], 1 }
  0x52   :  { %111 = vsyncpa [#allocation9], 1 }

</bundles_post_ra>
